<compile_context>
chip_gen: v7x
topology: tpu7x:2x2x1
jax: 0.10.0
libtpu: 0.0.40
codegen_flags: <defaults>
</compile_context>

<pallas_src>
import functools
import math

import jax
import jax.numpy as jnp
from jax.experimental import pallas as pl
from jax.experimental.pallas import tpu as pltpu

_LANE = 128


def _round_up(n, m):
    return ((n + m - 1) // m) * m


def _self_attention_kernel(x_ref, wqkv_ref, o_ref, *, d_pad):
    # x_ref:    (1, seq, d_in_pad)   float32
    # wqkv_ref: (d_in_pad, 3*d_pad)  bfloat16 (pre-transposed, pre-scaled, zero-padded)
    # o_ref:    (1, seq, d_pad)      float32
    x = x_ref[0].astype(jnp.bfloat16)                        # (seq, d_in_pad)

    # Fused Q/K/V projection: one bf16 MXU pass, f32 accumulation.
    # The 1/sqrt(d_out) scale is already folded into the W_q slice on the host.
    qkv = jnp.dot(x, wqkv_ref[...], preferred_element_type=jnp.float32)  # (seq, 3*d_pad)
    q = qkv[:, :d_pad]
    k = qkv[:, d_pad:2 * d_pad]
    v = qkv[:, 2 * d_pad:]

    # attention scores = q @ k^T, contracted on dim 1 of both operands so no transpose
    # is materialized (zero-padded feature columns contribute nothing).
    scores = jax.lax.dot_general(
        q.astype(jnp.bfloat16), k.astype(jnp.bfloat16),
        dimension_numbers=(((1,), (1,)), ((), ())),
        preferred_element_type=jnp.float32)                  # (seq, seq)

    # Numerically-stable softmax in f32; reciprocal lowered to the EUP (approx=True).
    m = jnp.max(scores, axis=-1, keepdims=True)
    p = jnp.exp(scores - m)
    denom = jnp.sum(p, axis=-1, keepdims=True)
    weights = p * pl.reciprocal(denom, approx=True)

    # context = attention_weights @ v (bf16 operands, f32 accumulation).
    ctx = jnp.dot(weights.astype(jnp.bfloat16), v.astype(jnp.bfloat16),
                  preferred_element_type=jnp.float32)        # (seq, d_pad)
    o_ref[0] = ctx.astype(o_ref.dtype)


def self_attention_v2(x, w_q, w_k, w_v):
    """SelfAttentionV2.forward.

    x:   (seq, d_in) or (batch, seq, d_in) float32  (batch = independent sequences/heads)
    w_*: (d_out, d_in) float32 (PyTorch nn.Linear weight layout, no bias)
    returns (seq, d_out) / (batch, seq, d_out) float32
    """
    squeeze_batch = x.ndim == 2
    if squeeze_batch:
        x = x[None]
    batch, seq, d_in = x.shape
    d_out = w_q.shape[0]

    d_in_pad = _round_up(d_in, _LANE)
    d_pad = _round_up(d_out, _LANE)
    scale = 1.0 / math.sqrt(float(d_out))  # keys.shape[-1] ** 0.5 in the PyTorch module

    def prep(w, s):
        # (d_out, d_in) -> transpose, scale, zero-pad to (d_in_pad, d_pad)
        wt = (w.astype(jnp.float32) * s).T
        return jnp.pad(wt, ((0, d_in_pad - d_in), (0, d_pad - d_out)))

    # Single fused, pre-transposed, lane-dense QKV weight operand (bf16 for the MXU).
    w_qkv = jnp.concatenate(
        [prep(w_q, scale), prep(w_k, 1.0), prep(w_v, 1.0)], axis=1).astype(jnp.bfloat16)

    # Zero-padded columns are exact no-ops in every contraction. x stays f32 in HBM
    # (tiny) and is cast to bf16 inside the kernel right before the MXU.
    x_pad = jnp.pad(x.astype(jnp.float32), ((0, 0), (0, 0), (0, d_in_pad - d_in)))

    out = pl.pallas_call(
        functools.partial(_self_attention_kernel, d_pad=d_pad),
        out_shape=jax.ShapeDtypeStruct((batch, seq, d_pad), jnp.float32),
        grid_spec=pltpu.PrefetchScalarGridSpec(
            num_scalar_prefetch=0,
            grid=(batch,),
            in_specs=[
                pl.BlockSpec((1, seq, d_in_pad), lambda b: (b, 0, 0)),
                pl.BlockSpec((d_in_pad, 3 * d_pad), lambda b: (0, 0)),  # resident weights
            ],
            out_specs=pl.BlockSpec((1, seq, d_pad), lambda b: (b, 0, 0)),
        ),
        compiler_params=pltpu.CompilerParams(
            dimension_semantics=("parallel",)),  # lets v7x shard the batch over its 2 TCs
        # TODO(synk): for realistic seq lengths switch to a flash-style KV-tiled grid
        # with online-softmax accumulators and a vmem_limit_bytes sized per generation.
    )(x_pad, w_qkv)

    out = out[:, :, :d_out]
    return out[0] if squeeze_batch else out


def _reference(x, w_q, w_k, w_v):
    d_out = w_q.shape[0]
    q = jnp.einsum("...sd,od->...so", x, w_q)
    k = jnp.einsum("...sd,od->...so", x, w_k)
    v = jnp.einsum("...sd,od->...so", x, w_v)
    scores = jnp.einsum("...qo,...ko->...qk", q, k) / math.sqrt(d_out)
    w = jax.nn.softmax(scores, axis=-1)
    return jnp.einsum("...qk,...ko->...qo", w, v)


def _torch_linear_init(key, d_out, d_in):
    # Deterministic stand-in for torch.nn.Linear default init: U(-1/sqrt(d_in), 1/sqrt(d_in))
    bound = 1.0 / math.sqrt(d_in)
    return jax.random.uniform(key, (d_out, d_in), jnp.float32, minval=-bound, maxval=bound)


if __name__ == "__main__":
    batch, seq, d_in, d_out = 4, 8, 32, 16  # small shapes consistent with the module

    root = jax.random.PRNGKey(0)
    kx, kq, kk, kv = jax.random.split(root, 4)

    x = jax.random.normal(kx, (batch, seq, d_in), jnp.float32)
    w_q = _torch_linear_init(kq, d_out, d_in)
    w_k = _torch_linear_init(kk, d_out, d_in)
    w_v = _torch_linear_init(kv, d_out, d_in)

    out = self_attention_v2(x, w_q, w_k, w_v)
    jax.block_until_ready(out)

    ref = _reference(x, w_q, w_k, w_v)
    # bf16 MXU operands (f32 accumulation) -> looser tolerance than the pure-f32 version.
    assert out.shape == (batch, seq, d_out)
    assert jnp.allclose(out, ref, atol=2e-2, rtol=2e-2), "batched mismatch vs reference"

    # 2-D path, exactly the PyTorch module's forward signature (single sequence).
    out2d = self_attention_v2(x[0], w_q, w_k, w_v)
    jax.block_until_ready(out2d)
    assert out2d.shape == (seq, d_out)
    assert jnp.allclose(out2d, ref[0], atol=2e-2, rtol=2e-2), "2-D mismatch vs reference"

    print("KERNEL_OK")
</pallas_src>

<mosaic_0001>
module attributes {stable_mosaic.version = 11 : i64} {
  func.func @_self_attention_kernel(%arg0: i32, %arg1: memref<1x8x128xf32, #tpu.memory_space<vmem>>, %arg2: memref<128x384xbf16, #tpu.memory_space<vmem>>, %arg3: memref<1x8x128xf32, #tpu.memory_space<vmem>>) attributes {dimension_semantics = [#tpu.dimension_semantics<parallel>], iteration_bounds = array<i64: 4>, scalar_prefetch = 0 : i64, scratch_operands = 0 : i64, tpu.core_type = #tpu.core_type<tc>, window_params = [{transform_indices = @transform_0, window_bounds = array<i64: 1, 8, 128>}, {pipeline_mode = #tpu.pipeline_mode<synchronous>, transform_indices = @transform_1, window_bounds = array<i64: 128, 384>}, {transform_indices = @transform_2, window_bounds = array<i64: 1, 8, 128>}]} {
    %c0 = arith.constant 0 : index
    %c0_0 = arith.constant 0 : index
    %c0_1 = arith.constant 0 : index
    %0 = vector.load %arg1[%c0, %c0_0, %c0_1] : memref<1x8x128xf32, #tpu.memory_space<vmem>>, vector<1x8x128xf32>
    %1 = vector.shape_cast %0 : vector<1x8x128xf32> to vector<8x128xf32>
    %2 = arith.truncf %1 : vector<8x128xf32> to vector<8x128xbf16>
    %c0_2 = arith.constant 0 : index
    %c0_3 = arith.constant 0 : index
    %3 = vector.load %arg2[%c0_2, %c0_3] : memref<128x384xbf16, #tpu.memory_space<vmem>>, vector<128x384xbf16>
    %cst = arith.constant dense<0.000000e+00> : vector<8x384xf32>
    %4 = tpu.matmul %2, %3, %cst {dimension_numbers = #tpu.dot_dimension_numbers<[1], [0], [0], [1], [0, 0, 1, 1], [], []>} : vector<8x128xbf16>, vector<128x384xbf16>, vector<8x384xf32> -> vector<8x384xf32>
    %5 = vector.extract_strided_slice %4 {offsets = [0, 0], sizes = [8, 128], strides = [1, 1]} : vector<8x384xf32> to vector<8x128xf32>
    %6 = vector.extract_strided_slice %4 {offsets = [0, 128], sizes = [8, 128], strides = [1, 1]} : vector<8x384xf32> to vector<8x128xf32>
    %7 = vector.extract_strided_slice %4 {offsets = [0, 256], sizes = [8, 128], strides = [1, 1]} : vector<8x384xf32> to vector<8x128xf32>
    %8 = arith.truncf %5 : vector<8x128xf32> to vector<8x128xbf16>
    %9 = arith.truncf %6 : vector<8x128xf32> to vector<8x128xbf16>
    %cst_4 = arith.constant dense<0.000000e+00> : vector<8x8xf32>
    %10 = tpu.matmul %8, %9, %cst_4 {dimension_numbers = #tpu.dot_dimension_numbers<[1], [1], [0], [0], [0, 0, 1, 0], [], []>} : vector<8x128xbf16>, vector<8x128xbf16>, vector<8x8xf32> -> vector<8x8xf32>
    %cst_5 = arith.constant dense<0xFF800000> : vector<8xf32>
    %11 = vector.multi_reduction <maximumf>, %10, %cst_5 [1] : vector<8x8xf32> to vector<8xf32>
    %12 = vector.shape_cast %11 : vector<8xf32> to vector<8x1xf32>
    %13 = vector.broadcast %12 : vector<8x1xf32> to vector<8x8xf32>
    %14 = arith.subf %10, %13 : vector<8x8xf32>
    %15 = math.exp %14 : vector<8x8xf32>
    %cst_6 = arith.constant dense<0.000000e+00> : vector<8xf32>
    %16 = vector.multi_reduction <add>, %15, %cst_6 [1] : vector<8x8xf32> to vector<8xf32>
    %17 = vector.shape_cast %16 : vector<8xf32> to vector<8x1xf32>
    %18 = tpu.reciprocal %17 {approx = true} : vector<8x1xf32> -> vector<8x1xf32>
    %19 = vector.broadcast %18 : vector<8x1xf32> to vector<8x8xf32>
    %20 = arith.mulf %15, %19 : vector<8x8xf32>
    %21 = arith.truncf %20 : vector<8x8xf32> to vector<8x8xbf16>
    %22 = arith.truncf %7 : vector<8x128xf32> to vector<8x128xbf16>
    %cst_7 = arith.constant dense<0.000000e+00> : vector<8x128xf32>
    %23 = tpu.matmul %21, %22, %cst_7 {dimension_numbers = #tpu.dot_dimension_numbers<[1], [0], [0], [1], [0, 0, 1, 1], [], []>} : vector<8x8xbf16>, vector<8x128xbf16>, vector<8x128xf32> -> vector<8x128xf32>
    %c0_8 = arith.constant 0 : index
    %c0_9 = arith.constant 0 : index
    %c0_10 = arith.constant 0 : index
    %24 = vector.load %arg3[%c0_8, %c0_9, %c0_10] : memref<1x8x128xf32, #tpu.memory_space<vmem>>, vector<1x8x128xf32>
    %25 = vector.shape_cast %24 : vector<1x8x128xf32> to vector<8x128xf32>
    %26 = vector.shape_cast %23 : vector<8x128xf32> to vector<1x8x128xf32>
    tpu.vector_store %arg3[%c0_8, %c0_9, %c0_10], %26 {strides = array<i32>} : memref<1x8x128xf32, #tpu.memory_space<vmem>>, vector<1x8x128xf32>,
    return
  }
  func.func @transform_0(%arg0: i32) -> (i32, i32, i32) {
    %c0_i32 = arith.constant 0 : i32
    %c0_i32_0 = arith.constant 0 : i32
    %c0_i32_1 = arith.constant 0 : i32
    return %arg0, %c0_i32, %c0_i32_0 : i32, i32, i32
  }
  func.func @transform_1(%arg0: i32) -> (i32, i32) {
    %c0_i32 = arith.constant 0 : i32
    %c0_i32_0 = arith.constant 0 : i32
    %c0_i32_1 = arith.constant 0 : i32
    return %c0_i32, %c0_i32_0 : i32, i32
  }
  func.func @transform_2(%arg0: i32) -> (i32, i32, i32) {
    %c0_i32 = arith.constant 0 : i32
    %c0_i32_0 = arith.constant 0 : i32
    %c0_i32_1 = arith.constant 0 : i32
    return %arg0, %c0_i32, %c0_i32_0 : i32, i32, i32
  }
}

</mosaic_0001>

<bundles_post_ra>
// kernel: tpu_custom_call.1
= control target key start
LH: loop header
LB: loop body
LE: loop exit
PB: predicated region body
PF: predicated region fallthrough
CT: control target
= control target key end

     0   :  { %7 = vsyncpa [#allocation3], 0  ;;  %s1151_s0 = inlined_call_operand.hbm [shape: f32[4,8,128], index: 0, kind: input, shape index: {}]   ;;  %s1152_s1 = inlined_call_operand.hbm [shape: bf16[128,384], index: 1, kind: input, shape index: {}]   ;;  %s1153_s2 = inlined_call_operand.hbm [shape: f32[4,8,128], index: 2, kind: output, shape index: {}]  }
   0x1   :  { %9 = vsyncpa [#allocation3 + $0x1], 0 }
   0x2   :  { %10 = vsyncpa [#allocation6], 0 }
   0x3   :  { %11 = vsyncpa [#allocation4], 0 }
   0x4   :  { %13 = vsyncpa [#allocation4 + $0x1], 0  ;;  %s951_s9 = smov 0   ;;  %s953_s10 = smov 0  }
   0x5   :  { %s955_s11 = smov 0   ;;  %s957_s12 = smov 0  }
   0x6 LB: > { %s972_s13 = sadd.s32 4294967295, %s926_s12   ;;  %s616_s14 = sadd.s32 4294967294, %s926_s12   ;;  %s926_s12 = sphi %s957_s12, %s1172_s12   ;;  %s922_s11 = sphi %s955_s11, %s1171_s11   ;;  %s918_s10 = sphi %s953_s10, %s1170_s10   ;;  %s914_s9 = sphi %s951_s9, %s1169_s9  }
   0x7   : > { %p39_p0 = scmp.ne.s32.totalorder %s918_s10, %s914_s9  ;;  %p1154_p1 = scmp.eq.s32.totalorder %s972_s13, 0 }
   0x8   : > { %p90_p3 = scmp.eq.s32.totalorder %s616_s14, 3  ;;  %p617_p5 = scmp.ge.s32.totalorder %s926_s12, 1 }
   0x9   : > { %p981_p4 = por %p1154_p1, %p39_p0  ;;  %p97_p7 = scmp.lt.s32.totalorder %s926_s12, 5 }
   0xa   : > { %p986_p6 = por %p90_p3, %p39_p0  ;;  %s928_s18 = smov [#allocation5]  }
   0xb   : > { %s1157_s15 = scalar_select %p981_p4, 1, 0 }
   0xc   : > { %s1158_s16 = scalar_select %p986_p6, 1, 0 }
   0xd   : > { %p991_p8 = pnand %p617_p5, %p97_p7  ;;  %s109_s19 = sshll.u32 %s928_s18, 4  ;;  %s110_s19 = int_to_ptr.vmem [resolvable:$true] %s109_s19 }
   0xe   : > { %s1004_s21 = sadd.s32 1, %s926_s12   ;;  %s26_s22 = sadd.s32 1, %s922_s11 }
   0xf   : > { %s1159_s17 = scalar_select %p991_p8, 1, 0 }
  0x10   : > { %p708_p9 = pneg %p991_p8  ;;  %s23_s23 = ssub.s32 %s926_s12, %s1004_s21 }
  0x11   : > { %s798_s26 = scalar_lea.hbm %s1152_s1, 3072 }
  0x12   : > { %p999_p10 = pnand %p708_p9, %p1154_p1  ;;  %p799_p11 = scmp.ne.s32.totalorder %s1152_s1, %s798_s26 }
  0x13   : > { %p805_p3 = scmp.lt.u32.totalorder %s798_s26, %s1152_s1 }
  0x14   : > { %p800_p12 = pneg %p999_p10 }
  0x16   : > { %p801_p13 = pnand %p800_p12, %p799_p11 }
  0x18   : > { %p802_p0 = pneg %p801_p13 }
  0x1a   : > { %p807_p5 = pnand %p805_p3, %p802_p0 }
  0x1c   : > { %810 = shalt.err (!%p807_p5)
}
  0x1d   : > { %s811_s3 = scalar_lea.vmem %s110_s19, 3072  ;;  %p819_p2 = scmp.lt.s32.totalorder %s110_s19, %s110_s19 }
  0x1e   : > { %p812_p7 = scmp.ne.s32.totalorder %s110_s19, %s811_s3  ;;  %p820_p6 = scmp.lt.s32.totalorder %s811_s3, %s811_s3 }
  0x20   : > { %p814_p9 = pnand %p812_p7, %p800_p12  ;;  %p821_p4 = por %p820_p6, %p819_p2 }
  0x22   : > { %p815_p1 = pneg %p814_p9 }
  0x24   : > { %p822_p8 = pnand %p821_p4, %p815_p1 }
  0x26   : > { %825 = shalt.err (!%p822_p8)
}
  0x27   : > { %s929_s4 = smov 192   ;;  %s930_s5 = smov 12  }
  0x28   : > { %711 = dma.hbm_to_vmem [thread:$0]  (!%p999_p10), %s1152_s1, 3072, %s110_s19, [#allocation6], %s929_s4, %s929_s4, %s930_s5  }
  0x29   : > { %p24_p11 = scmp.eq.s32.totalorder %s23_s23, 0  ;;  %p33_p2 = scmp.ne.s32.totalorder %s922_s11, %s918_s10 }
  0x2a   : > { %p34_p1 = scmp.eq.s32.totalorder %s926_s12, 0  ;;  %p721_p4 = scmp.lt.s32.totalorder %s926_s12, 4 }
  0x2b   : > { %s1030_s8 = scalar_select %p24_p11, %s922_s11, %s26_s22  }
  0x2c   : > { %p35_p6 = por %p34_p1, %p33_p2  ;;  %p1161_p8 = scmp.eq.s32.totalorder %s972_s13, 3 }
  0x2d   : > { %s123_s18 = sand.u32 1, %s922_s11   ;;  %s621_s24 = sshll.u32 %s926_s12, 7 }
  0x2e   : > { %p1034_p12 = por %p1161_p8, %p33_p2  ;;  %s620_s25 = sshll.u32 %s123_s18, 3 }
  0x2f   : > { %s1043_s27 = scalar_lea.hbm %s1151_s0, %s621_s24  ;;  %s127_s19 = scalar_lea.vmem [#allocation2], %s620_s25 }
  0x30   : > { %s134_s22 = sshll.u32 %s127_s19, 4  ;;  %p1045_p10 = pnand %p721_p4, %p35_p6  ;;  %s1049_s22 = int_to_ptr.vmem [resolvable:$true] %s134_s22 }
  0x31   : > { %s124_s28 = scalar_lea.sflag [#allocation3], %s123_s18  ;;  %s826_s29 = scalar_lea.hbm %s1043_s27, 128 }
  0x32   : > { %p827_p13 = scmp.ne.s32.totalorder %s1043_s27, %s826_s29  ;;  %p828_p0 = pneg %p1045_p10 }
  0x33   : > { %s831_s4 = scalar_lea.hbm %s1151_s0, 512  ;;  %p832_p7 = scmp.lt.u32.totalorder %s1043_s27, %s1151_s0 }
  0x34   : > { %p829_p3 = pnand %p828_p0, %p827_p13  ;;  %p833_p9 = scmp.lt.u32.totalorder %s831_s4, %s826_s29 }
  0x35   : > { %p835_p2 = scmp.lt.u32.totalorder %s826_s29, %s1043_s27 }
  0x36   : > { %p830_p5 = pneg %p829_p3  ;;  %p834_p11 = por %p833_p9, %p832_p7 }
  0x38   : > { %p836_p1 = por %p835_p2, %p834_p11 }
  0x3a   : > { %p837_p4 = pnand %p836_p1, %p830_p5 }
  0x3c   : > { %840 = shalt.err (!%p837_p4)
}
  0x3d   : > { %s841_s7 = scalar_lea.vmem %s1049_s22, 128  ;;  %s931_s18 = smov [#allocation2]  }
  0x3e   : > { %p842_p6 = scmp.ne.s32.totalorder %s1049_s22, %s841_s7  ;;  %s846_s24 = sshll.u32 %s931_s18, 4  ;;  %s847_s24 = int_to_ptr.vmem [resolvable:$false] %s846_s24 }
  0x3f   : > { %s848_s25 = scalar_lea.vmem %s847_s24, 256  ;;  %p849_p3 = scmp.lt.s32.totalorder %s1049_s22, %s847_s24 }
  0x40   : > { %p844_p8 = pnand %p842_p6, %p828_p0  ;;  %p850_p7 = scmp.lt.s32.totalorder %s848_s25, %s841_s7 }
  0x42   : > { %p845_p13 = pneg %p844_p8  ;;  %p851_p9 = por %p850_p7, %p849_p3 }
  0x44   : > { %p852_p11 = pnand %p851_p9, %p845_p13 }
  0x46   : > { %855 = shalt.err (!%p852_p11)
}
  0x47   : > { %715 = dma.hbm_to_vmem [thread:$0]  (!%p1045_p10), %s1043_s27, 128, %s1049_s22, %s124_s28  }
  0x48   : > { %p1164_p5 = scmp.ne.s32.totalorder %s1159_s17, 0 }
  0x49   : > { %s1079_s20 = sand.u32 (!%p1164_p5), 1, %s918_s10   ;;  %p1165_p0 = scmp.ne.s32.totalorder (!%p1164_p5), %s1157_s15, 0 }
  0x4a   : > { %143 = sbr.rel (%p1164_p5) target bundleno = 1095 (0x447), region = 28  ;;  %s623_s26 = sshll.u32 (!%p1164_p5), %s1079_s20, 3 }
  0x4b   : > { %s146_s19 = scalar_lea.sflag (!%p1164_p5), [#allocation3], %s1079_s20  ;;  %s1085_s29 = scalar_lea.vmem (!%p1164_p5), [#allocation2], %s623_s26 }
  0x51   : > { %901 = dma.done.wait (%p1165_p0), %s146_s19, 128  }
  0x52   : > { %903 = vsyncadd (%p1165_p0), %s146_s19, 4294967168  ;;  %p1166_p10 = scmp.eq.s32.totalorder %s972_s13, 0 }
  0x54   : > { %905 = dma.done.wait (%p1166_p10), [#allocation6], 3072   ;;  %p1167_p2 = pmov %p1166_p10 }
  0x55   : > { %v932_v0 = vmov 0   ;;  %v762_v1 = vld [vmem:[#allocation5 + $0x4] ss:$12 sps:$4 sm:$0xff]   ;;  %v764_v2 = vld [vmem:[#allocation5] ss:$12 sps:$4 sm:$0xff]   ;;  %v933_v19 = vmov 0.0  }
  0x56   : > { %907 = vsyncadd (%p1167_p2), [#allocation6], 4294964224  ;;  %369 = vmatprep.mubr.bf16.mxu0 %v932_v0  ;;  %337 = vmatprep.subr.bf16.mxu0 %v762_v1  ;;  %v765_v3 = vld [vmem:[#allocation5 + $0x1c] ss:$12 sps:$4 sm:$0xff]   ;;  %v767_v4 = vld [vmem:[#allocation5 + $0x18] ss:$12 sps:$4 sm:$0xff]  }
  0x57   : > { %338 = vmatpush1.bf16.msra.mxu0 %v764_v2  ;;  %v768_v5 = vld [vmem:[#allocation5 + $0x34] ss:$12 sps:$4 sm:$0xff]   ;;  %v770_v6 = vld [vmem:[#allocation5 + $0x30] ss:$12 sps:$4 sm:$0xff]   ;;  %v771_v7 = vld [vmem:[#allocation5 + $0x4c] ss:$12 sps:$4 sm:$0xff]   ;;  %668 = vmatprep.subr.bf16.mxu1 %v933_v19 }
  0x58   : > { %339 = vmatprep.subr.bf16.mxu0 %v765_v3  ;;  %v773_v8 = vld [vmem:[#allocation5 + $0x48] ss:$12 sps:$4 sm:$0xff]   ;;  %v774_v9 = vld [vmem:[#allocation5 + $0x64] ss:$12 sps:$4 sm:$0xff]   ;;  %v776_v10 = vld [vmem:[#allocation5 + $0x60] ss:$12 sps:$4 sm:$0xff]  }
  0x59   : > { %v777_v11 = vld [vmem:[#allocation5 + $0x7c] ss:$12 sps:$4 sm:$0xff]   ;;  %v779_v12 = vld [vmem:[#allocation5 + $0x78] ss:$12 sps:$4 sm:$0xff]   ;;  %v780_v13 = vld [vmem:[#allocation5 + $0x94] ss:$12 sps:$4 sm:$0xff]  }
  0x5a   : > { %v782_v14 = vld [vmem:[#allocation5 + $0x90] ss:$12 sps:$4 sm:$0xff]   ;;  %v783_v15 = vld [vmem:[#allocation5 + $0xac] ss:$12 sps:$4 sm:$0xff]   ;;  %v785_v16 = vld [vmem:[#allocation5 + $0xa8] ss:$12 sps:$4 sm:$0xff]  }
  0x5b   : > { %340 = vmatpush1.bf16.msra.mxu0 %v767_v4  ;;  %v175_v17 = vld [vmem:[%s1085_s29] sm:$0xff]  ;;  %vm934_vm0 = vmmov 0   ;;  %v787_v27 = vld [vmem:[#allocation5 + $0x20] ss:$12 sps:$4 sm:$0xff]   ;;  %vm460_vm1 = vcmask 64512   ;;  %vm477_vm2 = vcmask 1043456  }
  0x5c   : > { %341 = vmatprep.subr.bf16.mxu0 %v768_v5  ;;  %v176_v18 = vpack.c.bf16 %v175_v17, %v175_v17  ;;  %684 = vmatprep.mubr.msk.bf16.mxu1 %vm934_vm0, %v933_v19  ;;  %v786_v26 = vld [vmem:[#allocation5 + $0x8] ss:$12 sps:$4 sm:$0xff]   ;;  %v788_v28 = vld [vmem:[#allocation5 + $0x38] ss:$12 sps:$4 sm:$0xff]   ;;  %v789_v29 = vld [vmem:[#allocation5 + $0x50] ss:$12 sps:$4 sm:$0xff]  }
  0x5d   : > { %669 = vmatpush3.bf16.msra.mxu1 %v786_v26  ;;  %v790_v30 = vld [vmem:[#allocation5 + $0x68] ss:$12 sps:$4 sm:$0xff]   ;;  %v791_v31 = vld [vmem:[#allocation5 + $0x80] ss:$12 sps:$4 sm:$0xff]   ;;  %v792_v32 = vld [vmem:[#allocation5 + $0x98] ss:$12 sps:$4 sm:$0xff]  }
  0x5e   : > { %670 = vmatprep.subr.bf16.mxu1 %v933_v19  ;;  %v793_v33 = vld [vmem:[#allocation5 + $0xb0] ss:$12 sps:$4 sm:$0xff]   ;;  %s173_s15 = scalar_lea.vmem [#allocation7], %s623_s26  ;;  %s652_s27 = sshll.u32 %s972_s13, 7 }
  0x5f   : > { %342 = vmatpush1.bf16.msra.mxu0 %v770_v6  ;;  %s536_s17 = sshll.u32 %s173_s15, 4  ;;  %s1110_s28 = scalar_lea.hbm %s1153_s2, %s652_s27  ;;  %s1105_s17 = int_to_ptr.vmem [resolvable:$true] %s536_s17 }
  0x60   : > { %343 = vmatprep.subr.bf16.mxu0 %v771_v7  ;;  %s523_s30 = scalar_lea.sflag [#allocation4], %s1079_s20  ;;  %s856_s3 = scalar_lea.vmem %s1105_s17, 128 }
  0x61   : > { %671 = vmatpush3.bf16.msra.mxu1 %v787_v27  ;;  %p857_p1 = scmp.ne.s32.totalorder %s1105_s17, %s856_s3  ;;  %s935_s13 = smov [#allocation7]  }
  0x62   : > { %672 = vmatprep.subr.bf16.mxu1 %v933_v19  ;;  %s860_s4 = sshll.u32 %s935_s13, 4  ;;  %s861_s4 = int_to_ptr.vmem [resolvable:$false] %s860_s4 }
  0x63   : > { %344 = vmatpush1.bf16.msra.mxu0 %v773_v8  ;;  %p858_p4 = pnand %p857_p1, %p1034_p12  ;;  %s862_s5 = scalar_lea.vmem %s861_s4, 256 }
  0x64   : > { %345 = vmatprep.subr.bf16.mxu0 %v774_v9  ;;  %p863_p8 = scmp.lt.s32.totalorder %s1105_s17, %s861_s4  ;;  %p864_p13 = scmp.lt.s32.totalorder %s862_s5, %s856_s3 }
  0x65   : > { %673 = vmatpush3.bf16.msra.mxu1 %v788_v28  ;;  %p859_p6 = pneg %p858_p4 }
  0x66   : > { %674 = vmatprep.subr.bf16.mxu1 %v933_v19  ;;  %p865_p3 = por %p864_p13, %p863_p8 }
  0x67   : > { %346 = vmatpush1.bf16.msra.mxu0 %v776_v10 }
  0x68   : > { %347 = vmatprep.subr.bf16.mxu0 %v777_v11  ;;  %p866_p7 = pnand %p865_p3, %p859_p6 }
  0x69   : > { %675 = vmatpush3.bf16.msra.mxu1 %v789_v29 }
  0x6a   : > { %676 = vmatprep.subr.bf16.mxu1 %v933_v19 }
  0x6b   : > { %348 = vmatpush1.bf16.msra.mxu0 %v779_v12 }
  0x6c   : > { %349 = vmatprep.subr.bf16.mxu0 %v780_v13 }
  0x6d   : > { %677 = vmatpush3.bf16.msra.mxu1 %v790_v30 }
  0x6e   : > { %678 = vmatprep.subr.bf16.mxu1 %v933_v19 }
  0x6f   : > { %350 = vmatpush1.bf16.msra.mxu0 %v782_v14 }
  0x70   : > { %351 = vmatprep.subr.bf16.mxu0 %v783_v15 }
  0x71   : > { %679 = vmatpush3.bf16.msra.mxu1 %v791_v31 }
  0x72   : > { %680 = vmatprep.subr.bf16.mxu1 %v933_v19 }
  0x73   : > { %352 = vmatpush1.bf16.msra.mxu0 %v785_v16 }
  0x74   : > { %688 = vmatprep.subr.bf16.mxu0 %v933_v19 }
  0x75   : > { %681 = vmatpush3.bf16.msra.mxu1 %v792_v32 }
  0x76   : > { %370 = vmatmul.mubr.bf16.vlgmr.msra.gmra.mrb[0].mxu0 %v176_v18  ;;  %682 = vmatprep.subr.bf16.mxu1 %v933_v19 }
  0x77   : > { %690 = vmatprep.mubr.msk.bf16.mxu0 %vm934_vm0, %v933_v19 }
  0x79   : > { %683 = vmatpush3.bf16.msra.mxu1 %v793_v33 }
  0x7a   : > { %694 = vmatprep.subr.bf16.mxu1 %v933_v19 }
  0x7c   : > { %685 = vmatmul.mubr.bf16.vlgmr.msra.gmra.mrb[0].mxu1 %v176_v18 }
  0x7d   : > { %696 = vmatprep.mubr.msk.bf16.mxu1 %vm934_vm0, %v933_v19 }
 0x149   : > { %v371_v20 = vpop.f32.mrb[0].mxu0 }
 0x14a   : > { %v373_v21 = vpop.f32.mrb[1].mxu0  ;;  %v418_v25 = vpack.c.bf16 %v371_v20, %v371_v20 }
 0x14b   : > { %v419_v22 = vpack.c.bf16 %v373_v21, %v373_v21  ;;  %v375_v23 = vpop.f32.mrb[2].mxu0 }
 0x14c   : > { %v376_v24 = vpop.f32.mrb[3].mxu0 }
 0x14d   : > { %689 = vmatpush3.bf16.xpose.msra.mxu0 %v419_v22 }
 0x14f   : > { %v412_v44 = vpop.f32.mrb[0].mxu1 }
 0x150   : > { %v686_v45 = vpop.f32.mrb[1].mxu1  ;;  %v473_v48 = vpack.c.bf16 %v412_v44, %v412_v44 }
 0x151   : > { %v415_v46 = vpop.f32.mrb[2].mxu1 }
 0x152   : > { %v687_v47 = vpop.f32.mrb[3].mxu1  ;;  %v479_v49 = vsel %vm477_vm2, %v473_v48, 0 }
 0x153   : > { %695 = vmatpush3.bf16.msra.mxu1 %v479_v49 }
 0x154   : > { %691 = vmatmul.mubr.bf16.vlgmr.msra.gmra.mrb[4].mxu0 %v418_v25 }
 0x227   : > { %v454_v34 = vpop.f32.mrb[4].mxu0 }
 0x228   : > { %v692_v35 = vpop.f32.mrb[5].mxu0  ;;  %v461_v36 = vsel %vm460_vm1, %v454_v34, -inf }
 0x229   : > { %462 = vmax.xlane.f32.xlu0 %v461_v36  ;;  %v457_v37 = vpop.f32.mrb[6].mxu0 }
 0x22a   : > { %v693_v38 = vpop.f32.mrb[7].mxu0 }
 0x2b6   : > { %v463_v39 = vpop.xlane.xlu0 %462 }
 0x2b7   : > { %v464_v40 = vsub.f32 %v454_v34, %v463_v39 }
 0x2b9   : > { %v465_v41 = vmul.f32 1.442695, %v464_v40 }
 0x2bb   : > { %794 = vpow2.f32 %v465_v41 }
 0x2c5   : > { %v795_v42 = vpop.eup %794 }
 0x2c6   : > { %v467_v43 = vsel %vm460_vm1, %v795_v42, 0.0 }
 0x2c7   : > { %468 = vadd.xlane.f32.xlu0 %v467_v43 }
 0x354   : > { %v469_v50 = vpop.xlane.xlu0 %468 }
 0x355   : > { %796 = vrcp.f32 %v469_v50 }
 0x35f   : > { %v797_v51 = vpop.eup %796 }
 0x360   : > { %v471_v52 = vmul.f32 %v797_v51, %v795_v42 }
 0x362   : > { %v472_v53 = vpack.c.bf16 %v471_v52, %v471_v52 }
 0x364   : > { %697 = vmatmul.mubr.msk.bf16.vlgmr.msra.gmra.mrb[4].mxu1 %vm460_vm1, %v472_v53 }
 0x437   : > { %v515_v54 = vpop.f32.mrb[4].mxu1 }
 0x438   : > { %521 = vst [vmem:[%s173_s15] sm:$0xff] %v515_v54  ;;  %v698_v55 = vpop.f32.mrb[5].mxu1 }
 0x439   : > { %v518_v56 = vpop.f32.mrb[6].mxu1 }
 0x43a   : > { %869 = shalt.err (!%p866_p7)
}
 0x43b   : > { %s870_s6 = scalar_lea.hbm %s1110_s28, 128  ;;  %s874_s24 = scalar_lea.hbm %s1153_s2, 512 }
 0x43c   : > { %p871_p9 = scmp.ne.s32.totalorder %s1110_s28, %s870_s6  ;;  %p875_p0 = scmp.lt.u32.totalorder %s1110_s28, %s1153_s2 }
 0x43d   : > { %p876_p10 = scmp.lt.u32.totalorder %s874_s24, %s870_s6  ;;  %p878_p1 = scmp.lt.u32.totalorder %s870_s6, %s1110_s28 }
 0x43e   : > { %p872_p11 = pnand %p871_p9, %p1034_p12 }
 0x43f   : > { %p877_p2 = por %p876_p10, %p875_p0 }
 0x440   : > { %p873_p5 = pneg %p872_p11 }
 0x441   : > { %p879_p4 = por %p878_p1, %p877_p2 }
 0x443   : > { %p880_p6 = pnand %p879_p4, %p873_p5 }
 0x445   : > { %883 = shalt.err (!%p880_p6)
}
 0x446   : > { %706 = dma.vmem_to_hbm [thread:$0]  (%p1034_p12), %s1105_s17, 128, %s1110_s28, %s523_s30   ;;  %v699_v57 = vpop.f32.mrb[7].mxu1 }
 0x447 PF: > { %p723_p8 = scmp.ge.s32.totalorder %s926_s12, 2  ;;  %s548_s26 = sand.u32 1, %s914_s9  }
 0x448   : > { %p1168_p13 = scmp.ne.s32.totalorder %s1158_s16, 0  ;;  %s549_s19 = scalar_lea.sflag [#allocation4], %s548_s26 }
 0x44a   : > { %p717_p3 = pnand %p723_p8, %p1168_p13 }
 0x44c   : > { %909 = dma.done.wait (!%p717_p3), %s549_s19, 128  }
 0x44d   : > { %911 = vsyncadd (!%p717_p3), %s549_s19, 4294967168  ;;  %p16_p7 = scmp.ge.s32.totalorder %s1004_s21, 6   ;;  %s1169_s9 = smov %s918_s10 }
 0x44e   : > { %s1170_s10 = smov %s922_s11  ;;  %s1171_s11 = smov %s1030_s8 }
 0x44f   : > { %s1172_s12 = smov %s1004_s21  ;;  %18 = sbr.rel (!%p16_p7) target bundleno = 6 (0x6), region = 77 }
 0x456   :  { %554 = vsyncpa [#allocation3], 1 }
 0x457   :  { %556 = vsyncpa [#allocation3 + $0x1], 1 }
 0x458   :  { %557 = vsyncpa [#allocation6], 1 }
 0x459   :  { %558 = vsyncpa [#allocation4], 1 }
 0x45a   :  { %560 = vsyncpa [#allocation4 + $0x1], 1 }

</bundles_post_ra>
